<compile_context>
chip_gen: v7x
topology: tpu7x:2x2x1
jax: 0.10.0
libtpu: 0.0.40
codegen_flags: <defaults>
</compile_context>

<pallas_src>
import functools

import jax
import jax.numpy as jnp
import numpy as np
from jax.experimental import pallas as pl
from jax.experimental.pallas import tpu as pltpu

# Deterministic "hyper-parameters" (module __init__ defaults alpha=None which
# would error in torch; pick concrete values in-script).
GAMMA = 2.0
ALPHA = 0.25

_LANE = 128
_SUBLANE = 8


def _round_up(x, m):
    return ((x + m - 1) // m) * m


def _vmem_capacity_bytes():
    """Best-effort physical VMEM query; falls back to the smallest (v7x) size."""
    try:
        info = pltpu.get_tpu_info()
        for attr in ("vmem_capacity_bytes", "vmem_bytes", "vmem_capacity"):
            v = getattr(info, attr, None)
            if v:
                return int(v)
    except Exception:
        pass
    return 64 * 1024 * 1024  # conservative: assume v7x-sized VMEM


def _choose_block_rows(n, c, logits_itemsize, vmem_cap_bytes):
    """Rows per block sized from the VMEM budget (labels padding included)."""
    lane_c = _round_up(max(c, 1), _LANE)
    # Per pipeline buffer, per row: lane-padded logits + lane-padded int32 label.
    bytes_per_row = lane_c * logits_itemsize + _LANE * 4

    if vmem_cap_bytes >= 100 * 1024 * 1024:      # v5e / v6e: 128 MiB physical
        per_buffer_budget = 20 * 1024 * 1024
        min_blocks = 1
    else:                                         # v7x: 64 MiB physical, 2 TCs
        per_buffer_budget = 10 * 1024 * 1024
        min_blocks = 2

    budget_rows = max(_SUBLANE, per_buffer_budget // bytes_per_row)
    if min_blocks > 1:
        # Keep >= min_blocks blocks so the "parallel" axis shards across cores.
        cap = max(_SUBLANE, _round_up(-(-n // min_blocks), _SUBLANE))
        budget_rows = min(budget_rows, cap)

    if budget_rows >= n:
        return n                                  # single block == full batch dim
    return max(_SUBLANE, (budget_rows // _SUBLANE) * _SUBLANE)


def _focal_loss_block_kernel(logits_ref, labels_ref, out_ref, *,
                             true_n, block_rows, gamma, alpha):
    logits = logits_ref[...].astype(jnp.float32)           # (TN, C), upcast in-kernel
    labels = labels_ref[...]                                # (TN, 1) int32
    tn, c = logits.shape

    # Numerically-stable log-softmax on the shifted logits only.
    m = jnp.max(logits, axis=-1, keepdims=True)             # (TN, 1)
    shifted = logits - m                                     # (TN, C)
    # TODO(synk): if a v6e/v7x bundle dump shows the EUP exp as the binding
    # slot, evaluate this exp/sum in bf16 (keep logpt / focal math in f32).
    log_denom = jnp.log(jnp.sum(jnp.exp(shifted), axis=-1, keepdims=True))

    # Gather the label logit via a select on the shifted values (no gather,
    # no one-hot cast+multiply).
    class_ids = jax.lax.broadcasted_iota(jnp.int32, (tn, c), 1)
    shifted_y = jnp.sum(jnp.where(class_ids == labels, shifted, 0.0),
                        axis=-1, keepdims=True)              # (TN, 1)

    logpt = shifted_y - log_denom                             # = -cross_entropy
    pt = jnp.exp(logpt)
    one_m_pt = jnp.maximum(1.0 - pt, 0.0)                     # clamp NaN hazard

    g = float(gamma)
    if g == 0.0:
        mod = jnp.ones_like(one_m_pt)
    elif g == int(g) and int(g) > 0:
        # Integer gamma: repeated multiply on the VALU (no EUP log/exp).
        mod = one_m_pt
        for _ in range(int(g) - 1):
            mod = mod * one_m_pt
    else:
        mod = jnp.exp(g * jnp.log(jnp.maximum(one_m_pt, 1e-30)))

    per_row = (-alpha) * mod * logpt                          # (TN, 1)

    # Mask ragged rows of the (unpadded) last block AFTER all per-row math so
    # any unspecified values read out-of-bounds are discarded by the select.
    row_ids = pl.program_id(0) * block_rows + jax.lax.broadcasted_iota(
        jnp.int32, (tn, 1), 0)
    per_row = jnp.where(row_ids < true_n, per_row, 0.0)

    # Lane-dense (8,128) partial-sum tile per block: unmasked store, and the
    # block shape satisfies the (8,128) rule for any number of blocks.
    block_sum = jnp.sum(per_row)
    out_ref[...] = jnp.broadcast_to(block_sum, out_ref.shape).astype(jnp.float32)


def focal_loss(outputs, data_y, gamma=GAMMA, alpha=ALPHA, block_rows=None):
    """outputs: (N, C) float logits (any float dtype); data_y: (N,) int labels."""
    n, c = outputs.shape
    labels2d = data_y.astype(jnp.int32).reshape(n, 1)         # tiny (4N bytes)

    itemsize = jnp.dtype(outputs.dtype).itemsize
    vmem_cap = _vmem_capacity_bytes()
    if block_rows is None:
        block_rows = _choose_block_rows(n, c, itemsize, vmem_cap)
    block_rows = int(min(block_rows, n))
    num_blocks = pl.cdiv(n, block_rows)

    kernel = functools.partial(
        _focal_loss_block_kernel,
        true_n=n, block_rows=block_rows, gamma=gamma, alpha=alpha)

    # Deeper buffering only when tiles are tiny (per-step DMA ~ fixed overhead).
    logits_tile_bytes = block_rows * _round_up(c, _LANE) * itemsize
    if num_blocks >= 3 and logits_tile_bytes < (2 * 1024 * 1024):
        logits_spec = pl.BlockSpec((block_rows, c), lambda i: (i, 0),
                                   pipeline_mode=pl.Buffered(3))
    else:
        logits_spec = pl.BlockSpec((block_rows, c), lambda i: (i, 0))

    vmem_limit = (80 * 1024 * 1024 if vmem_cap >= 100 * 1024 * 1024
                  else 40 * 1024 * 1024)

    partials = pl.pallas_call(
        kernel,
        out_shape=jax.ShapeDtypeStruct((num_blocks, _SUBLANE, _LANE), jnp.float32),
        grid=(num_blocks,),
        in_specs=[
            logits_spec,
            pl.BlockSpec((block_rows, 1), lambda i: (i, 0)),
        ],
        out_specs=pl.BlockSpec((1, _SUBLANE, _LANE), lambda i: (i, 0, 0)),
        compiler_params=pltpu.CompilerParams(
            dimension_semantics=("parallel",),
            vmem_limit_bytes=vmem_limit),
    )(outputs, labels2d)

    # Tiny final reduction in the wrapper; divide by the TRUE batch size.
    return jnp.sum(partials[:, 0, 0]) / n


def focal_loss_ref(outputs, data_y, gamma=GAMMA, alpha=ALPHA):
    """Plain-JAX reference mirroring torch.nn.functional.cross_entropy."""
    logits = outputs.astype(jnp.float32)
    lse = jax.nn.logsumexp(logits, axis=-1)
    logit_y = jnp.take_along_axis(
        logits, data_y.astype(jnp.int32)[:, None], axis=-1)[:, 0]
    logpt = logit_y - lse
    pt = jnp.exp(logpt)
    focal = -(jnp.maximum(1.0 - pt, 0.0) ** gamma) * logpt
    return jnp.mean(alpha * focal)


if __name__ == "__main__":
    key = jax.random.PRNGKey(0)
    k1, k2 = jax.random.split(key)

    N, C = 8, 32  # batch of 8 samples, 32 classes
    outputs = jax.random.normal(k1, (N, C), dtype=jnp.float32)
    data_y = jax.random.randint(k2, (N,), 0, C, dtype=jnp.int32)

    loss = focal_loss(outputs, data_y)
    jax.block_until_ready(loss)

    ref = focal_loss_ref(outputs, data_y)
    assert np.allclose(np.asarray(loss), np.asarray(ref), rtol=1e-5, atol=1e-6), (
        loss, ref)

    print("KERNEL_OK")
</pallas_src>

<mosaic_0001>
module attributes {stable_mosaic.version = 11 : i64} {
  func.func @_focal_loss_block_kernel(%arg0: i32, %arg1: memref<8x32xf32, #tpu.memory_space<vmem>>, %arg2: memref<8x1xi32, #tpu.memory_space<vmem>>, %arg3: memref<1x8x128xf32, #tpu.memory_space<vmem>>) attributes {dimension_semantics = [#tpu.dimension_semantics<parallel>], iteration_bounds = array<i64: 1>, scalar_prefetch = 0 : i64, scratch_operands = 0 : i64, tpu.core_type = #tpu.core_type<tc>, window_params = [{transform_indices = @transform_0, window_bounds = array<i64: 8, 32>}, {transform_indices = @transform_1, window_bounds = array<i64: 8, 1>}, {transform_indices = @transform_2, window_bounds = array<i64: 1, 8, 128>}]} {
    %c0 = arith.constant 0 : index
    %c0_0 = arith.constant 0 : index
    %0 = vector.load %arg1[%c0, %c0_0] : memref<8x32xf32, #tpu.memory_space<vmem>>, vector<8x32xf32>
    %c0_1 = arith.constant 0 : index
    %c0_2 = arith.constant 0 : index
    %1 = vector.load %arg2[%c0_1, %c0_2] : memref<8x1xi32, #tpu.memory_space<vmem>>, vector<8x1xi32>
    %cst = arith.constant dense<0xFF800000> : vector<8xf32>
    %2 = vector.multi_reduction <maximumf>, %0, %cst [1] : vector<8x32xf32> to vector<8xf32>
    %3 = vector.shape_cast %2 : vector<8xf32> to vector<8x1xf32>
    %4 = vector.broadcast %3 : vector<8x1xf32> to vector<8x32xf32>
    %5 = arith.subf %0, %4 : vector<8x32xf32>
    %6 = math.exp %5 : vector<8x32xf32>
    %cst_3 = arith.constant dense<0.000000e+00> : vector<8xf32>
    %7 = vector.multi_reduction <add>, %6, %cst_3 [1] : vector<8x32xf32> to vector<8xf32>
    %8 = vector.shape_cast %7 : vector<8xf32> to vector<8x1xf32>
    %9 = math.log %8 : vector<8x1xf32>
    %10 = tpu.iota {dimensions = array<i32: 1>} : vector<8x32xi32>
    %11 = vector.broadcast %1 : vector<8x1xi32> to vector<8x32xi32>
    %12 = arith.cmpi eq, %10, %11 : vector<8x32xi32>
    %cst_4 = arith.constant 0.000000e+00 : f32
    %13 = vector.broadcast %cst_4 : f32 to vector<8x32xf32>
    %14 = arith.select %12, %5, %13 : vector<8x32xi1>, vector<8x32xf32>
    %cst_5 = arith.constant dense<0.000000e+00> : vector<8xf32>
    %15 = vector.multi_reduction <add>, %14, %cst_5 [1] : vector<8x32xf32> to vector<8xf32>
    %16 = vector.shape_cast %15 : vector<8xf32> to vector<8x1xf32>
    %17 = arith.subf %16, %9 : vector<8x1xf32>
    %18 = math.exp %17 : vector<8x1xf32>
    %cst_6 = arith.constant 1.000000e+00 : f32
    %19 = vector.broadcast %cst_6 : f32 to vector<8x1xf32>
    %20 = arith.subf %19, %18 : vector<8x1xf32>
    %cst_7 = arith.constant 0.000000e+00 : f32
    %21 = vector.broadcast %cst_7 : f32 to vector<8x1xf32>
    %22 = arith.maximumf %20, %21 : vector<8x1xf32>
    %23 = arith.mulf %22, %22 : vector<8x1xf32>
    %cst_8 = arith.constant -2.500000e-01 : f32
    %24 = vector.broadcast %cst_8 : f32 to vector<8x1xf32>
    %25 = arith.mulf %24, %23 : vector<8x1xf32>
    %26 = arith.mulf %25, %17 : vector<8x1xf32>
    %c8_i32 = arith.constant 8 : i32
    %27 = arith.muli %arg0, %c8_i32 : i32
    %28 = tpu.iota {dimensions = array<i32: 0>} : vector<8x1xi32>
    %29 = vector.broadcast %27 : i32 to vector<8x1xi32>
    %30 = arith.addi %29, %28 : vector<8x1xi32>
    %c8_i32_9 = arith.constant 8 : i32
    %31 = vector.broadcast %c8_i32_9 : i32 to vector<8x1xi32>
    %32 = arith.cmpi slt, %30, %31 : vector<8x1xi32>
    %cst_10 = arith.constant 0.000000e+00 : f32
    %33 = vector.broadcast %cst_10 : f32 to vector<8x1xf32>
    %34 = arith.select %32, %26, %33 : vector<8x1xi1>, vector<8x1xf32>
    %35 = vector.shape_cast %34 : vector<8x1xf32> to vector<1x8x1xf32>
    %cst_11 = arith.constant dense<0.000000e+00> : vector<1xf32>
    %36 = vector.multi_reduction <add>, %35, %cst_11 [1, 2] : vector<1x8x1xf32> to vector<1xf32>
    %37 = vector.shape_cast %36 : vector<1xf32> to vector<1x1x1xf32>
    %38 = vector.extract %37[0, 0, 0] : f32 from vector<1x1x1xf32>
    %39 = vector.broadcast %38 : f32 to vector<1x8x128xf32>
    %c0_12 = arith.constant 0 : index
    %c0_13 = arith.constant 0 : index
    %c0_14 = arith.constant 0 : index
    %40 = vector.load %arg3[%c0_12, %c0_13, %c0_14] : memref<1x8x128xf32, #tpu.memory_space<vmem>>, vector<1x8x128xf32>
    tpu.vector_store %arg3[%c0_12, %c0_13, %c0_14], %39 {strides = array<i32>} : memref<1x8x128xf32, #tpu.memory_space<vmem>>, vector<1x8x128xf32>,
    return
  }
  func.func @transform_0(%arg0: i32) -> (i32, i32) {
    %c0_i32 = arith.constant 0 : i32
    %c0_i32_0 = arith.constant 0 : i32
    return %arg0, %c0_i32 : i32, i32
  }
  func.func @transform_1(%arg0: i32) -> (i32, i32) {
    %c0_i32 = arith.constant 0 : i32
    %c0_i32_0 = arith.constant 0 : i32
    return %arg0, %c0_i32 : i32, i32
  }
  func.func @transform_2(%arg0: i32) -> (i32, i32, i32) {
    %c0_i32 = arith.constant 0 : i32
    %c0_i32_0 = arith.constant 0 : i32
    %c0_i32_1 = arith.constant 0 : i32
    return %arg0, %c0_i32, %c0_i32_0 : i32, i32, i32
  }
}

</mosaic_0001>

<bundles_post_ra>
// kernel: tpu_custom_call.1
= control target key start
LH: loop header
LB: loop body
LE: loop exit
PB: predicated region body
PF: predicated region fallthrough
CT: control target
= control target key end

     0   :  { %vm14_vm0 = vcmask 261120   ;;  %s151_s0 = inlined_call_operand.vmem [shape: f32[8,32], index: 0, kind: input, shape index: {}]   ;;  %s152_s1 = inlined_call_operand.vmem [shape: s32[8,1], index: 1, kind: input, shape index: {}]   ;;  %s153_s2 = inlined_call_operand.hbm [shape: f32[1,8,128], index: 2, kind: output, shape index: {}]  }
   0x1   :  { %v12_v0 = vld [vmem:[%s151_s0] sm:$0xff] }
   0x2   :  { %7 = vsyncpa [#allocation3], 0  ;;  %v15_v1 = vsel %vm14_vm0, %v12_v0, -inf  ;;  %v113_v2 = vmov 0   ;;  %v13_v3 = vld [vmem:[%s152_s1] sm:$0xff]  ;;  %v26_v7 = vlaneseq  ;;  %vm51_vm2 = vcmask 7168  }
   0x3   :  { %82 = vset.pattern.permute.xlu0 %v113_v2  ;;  %s114_s0 = smov [#allocation2]  }
   0x4   :  { %16 = vmax.xlane.f32.xlu0 %v15_v1  ;;  %v27_v8 = vand.u32 127, %v26_v7  ;;  %s70_s1 = sshll.u32 %s114_s0, 4  ;;  %s71_s1 = int_to_ptr.vmem [resolvable:$true] %s70_s1 }
   0x5   :  { %s89_s14 = scalar_lea.vmem %s71_s1, 128  ;;  %p94_p1 = scmp.lt.s32.totalorder %s71_s1, %s71_s1 }
   0x6   :  { %p90_p0 = scmp.ne.s32.totalorder %s71_s1, %s89_s14  ;;  %p95_p2 = scmp.lt.s32.totalorder %s89_s14, %s89_s14 }
   0x8   :  { %p96_p3 = por %p95_p2, %p94_p1 }
   0xa   :  { %p97_p4 = pnand %p96_p3, %p90_p0 }
  0x1a   :  { %29 = vperm.xlu0 %82, %v13_v3  }
  0x91   :  { %v17_v4 = vpop.xlane.xlu0 %16 }
  0x92   :  { %v18_v5 = vsub.f32 %v12_v0, %v17_v4 }
  0x94   :  { %v19_v6 = vmul.f32 1.442695, %v18_v5 }
  0x96   :  { %83 = vpow2.f32 %v19_v6 }
  0x99   :  { %v30_v9 = vpop.permute.xlu0 %29 }
  0x9a   :  { %vm31_vm1 = vcmp.eq.s32.totalorder %v27_v8, %v30_v9 }
  0x9b   :  { %v32_v12 = vsel %vm31_vm1, %v18_v5, 0.0 }
  0x9c   :  { %v33_v13 = vsel %vm14_vm0, %v32_v12, 0.0 }
  0xa0   :  { %v84_v10 = vpop.eup %83 }
  0xa1   :  { %v21_v11 = vsel %vm14_vm0, %v84_v10, 0.0 }
  0xa2   :  { %22 = vadd.xlane.f32.xlu1 %v21_v11 }
  0xa6   :  { %34 = vadd.xlane.f32.xlu1 %v33_v13 }
 0x12f   :  { %v23_v14 = vpop.xlane.xlu1 %22 }
 0x130   :  { %85 = vlog2.f32 %v23_v14 }
 0x133   :  { %v35_v17 = vpop.xlane.xlu1 %34 }
 0x13a   :  { %v86_v15 = vpop.eup %85 }
 0x13b   :  { %v25_v16 = vmul.f32 0.6931472, %v86_v15 }
 0x13d   :  { %v36_v18 = vsub.f32 %v35_v17, %v25_v16 }
 0x13f   :  { %v37_v19 = vmul.f32 1.442695, %v36_v18 }
 0x141   :  { %87 = vpow2.f32 %v37_v19 }
 0x14b   :  { %v88_v20 = vpop.eup %87 }
 0x14c   :  { %v39_v21 = vsub.f32 1.0, %v88_v20 }
 0x14e   :  { %v40_v22 = vmax.f32 %v39_v21, 0.0 }
 0x150   :  { %v41_v23 = vmul.f32 %v40_v22, %v40_v22 }
 0x152   :  { %v42_v24 = vmul.f32 -0.25, %v41_v23 }
 0x154   :  { %v43_v25 = vmul.f32 %v42_v24, %v36_v18 }
 0x156   :  { %v52_v26 = vsel %vm51_vm2, %v43_v25, 0.0 }
 0x157   :  { %53 = vadd.xlane.f32.xlu1 %v52_v26 }
 0x1e4   :  { %v54_v27 = vpop.xlane.xlu1 %53 }
 0x1e5   :  { %v55_v28 = vrot.slane %v54_v27, 4 }
 0x1e7   :  { %v56_v29 = vadd.f32 %v55_v28, %v54_v27 }
 0x1e9   :  { %v57_v30 = vrot.slane %v56_v29, 2 }
 0x1eb   :  { %v58_v31 = vadd.f32 %v57_v30, %v56_v29 }
 0x1ed   :  { %v59_v32 = vrot.slane %v58_v31, 1 }
 0x1ef   :  { %v60_v33 = vadd.f32 %v59_v32, %v58_v31 }
 0x1f1   :  { %78 = vpush %v60_v33 }
 0x222   :  { %s79_s13 = spop %78 }
 0x223   :  { %v62_v34 = vstv %s79_s13 }
 0x224   :  { %63 = vst [vmem:[#allocation2] sm:$0xff] %v62_v34 }
 0x225   :  { %100 = shalt.err (!%p97_p4)
}
 0x226   :  { %s101_s17 = scalar_lea.hbm %s153_s2, 128 }
 0x227   :  { %p102_p5 = scmp.ne.s32.totalorder %s153_s2, %s101_s17  ;;  %p105_p6 = scmp.lt.u32.totalorder %s101_s17, %s153_s2 }
 0x229   :  { %p107_p7 = pnand %p105_p6, %p102_p5 }
 0x22b   :  { %110 = shalt.err (!%p107_p7)
}
 0x22c   :  { %73 = dma.vmem_to_hbm [thread:$0]  %s71_s1, 128, %s153_s2, [#allocation3]  }
 0x22d   :  { %111 = dma.done.wait [#allocation3], 128  }
 0x22e   :  { %112 = vsyncadd [#allocation3], 4294967168 }
 0x22f   :  { %77 = vsyncpa [#allocation3], 1 }

</bundles_post_ra>
